<compile_context>
chip_gen: v7x
topology: tpu7x:2x2x1
jax: 0.10.0
libtpu: 0.0.40
codegen_flags: <defaults>
</compile_context>

<pallas_src>
import functools

import jax
import jax.numpy as jnp
from jax.experimental import pallas as pl
from jax.experimental.pallas import tpu as pltpu


def _dense_kernel(n_valid, w_ref, x0_ref, x1_ref, o_ref):
    """Fused (w_eye @ x) -> row-sum -> softmax over the last (lane) axis.

    w_ref  : (2, 2)        SMEM  (scalar reads)
    x0_ref : (TB, N_pad)   VMEM  x[:, 0, :] half (zero-padded lanes >= n_valid)
    x1_ref : (TB, N_pad)   VMEM  x[:, 1, :] half
    o_ref  : (TB, N_pad)   VMEM  softmax result (wrapper slices + restores keepdim)
    """
    # Column sums of w_eye (scalar ALU, SMEM reads).
    c0 = w_ref[0, 0] + w_ref[1, 0]
    c1 = w_ref[0, 1] + w_ref[1, 1]

    # Two scalar-weighted AXPYs == matmul + row-sum.  Cast per half (not the
    # whole 2N slab) to keep the f32 temp footprint minimal.
    s = (c0 * x0_ref[...].astype(jnp.float32)
         + c1 * x1_ref[...].astype(jnp.float32))            # (TB, N_pad)

    if n_valid != o_ref.shape[-1]:
        # Lane padding present: exclude padded lanes from the softmax.
        lane = jax.lax.broadcasted_iota(jnp.int32, s.shape, dimension=1)
        s = jnp.where(lane < n_valid, s, -jnp.inf)

    # Softmax over the last axis, f32 accumulation.
    m = jnp.max(s, axis=-1, keepdims=True)                   # XLU reduce
    e = jnp.exp(s - m)                                       # EUP
    denom = jnp.sum(e, axis=-1, keepdims=True)               # XLU reduce
    # Exact divide: memory-bound kernel, so the extra VALU cost is hidden and
    # rows sum to exactly 1 (approx vrcp had ~2^-12 relative error).
    o_ref[...] = (e / denom).astype(o_ref.dtype)


def _round_up(x, m):
    return -(-x // m) * m


def _choose_tb(b, n_pad, itemsize):
    """Pick the batch tile TB.

    - sublane-aligned for the dtype (8 f32 / 16 bf16 / 32 int8-fp8),
    - per-grid-step VMEM footprint (double-buffered x0/x1/out blocks plus f32
      temps) stays under ~8 MiB -> safe on v7x's 32 MiB scoped default and
      within the explicit 32 MiB limit we request on v5e,
    - capped at 1024 rows (>=512-row tiles already hit ~85% of HBM roofline),
    - keeps >=2 grid steps when the batch allows it so v7x can shard the
      'parallel' axis across its 2 TensorCores.
    """
    sub = {1: 32, 2: 16}.get(itemsize, 8)
    vmem_budget = 8 * 1024 * 1024
    bytes_per_row = n_pad * (6 * itemsize + 12)   # 2x-buffered in/in/out + ~3 f32 temps
    cap = max(sub, (min(1024, vmem_budget // bytes_per_row) // sub) * sub)
    b_sub = _round_up(b, sub)
    tb = min(cap, b_sub)
    if b_sub // tb < 2 and b_sub >= 2 * sub:
        tb = max(sub, ((b_sub // 2) // sub) * sub)
    return tb


@jax.jit
def dense_forward(x, w_eye):
    """Equivalent of Dense.forward(x) for x of shape (B, 2, N)."""
    B, two, N = x.shape
    assert two == 2 and w_eye.shape == (2, 2)
    itemsize = jnp.dtype(x.dtype).itemsize

    # Lane-pad N to a multiple of 128 (vreg-aligned halves, unmasked stores)
    # and pick a large, sublane-aligned batch tile.
    N_pad = _round_up(N, 128)
    TB = _choose_tb(B, N_pad, itemsize)
    B_pad = _round_up(B, TB)

    # Zero-pad (elided by XLA when no padding is needed) and flatten to a
    # lane-dense 2D slab: cols [0:N_pad] = x[:,0,:], cols [N_pad:2N_pad] = x[:,1,:].
    xp = jnp.pad(x, ((0, B_pad - B), (0, 0), (0, N_pad - N)))
    x2 = xp.reshape(B_pad, 2 * N_pad)

    grid = (B_pad // TB,)

    cost = pl.CostEstimate(
        flops=7 * B_pad * N_pad,                 # 2 AXPYs + softmax elementwise
        transcendentals=B_pad * N_pad,           # exp
        bytes_accessed=3 * B_pad * N_pad * itemsize + 16,
    )

    out2d = pl.pallas_call(
        functools.partial(_dense_kernel, N),
        out_shape=jax.ShapeDtypeStruct((B_pad, N_pad), x.dtype),
        grid=grid,
        in_specs=[
            pl.BlockSpec(memory_space=pltpu.MemorySpace.SMEM),   # w_eye (2,2)
            pl.BlockSpec((TB, N_pad), lambda b: (b, 0)),         # x[:, 0, :] half
            pl.BlockSpec((TB, N_pad), lambda b: (b, 1)),         # x[:, 1, :] half
        ],
        out_specs=pl.BlockSpec((TB, N_pad), lambda b: (b, 0)),
        compiler_params=pltpu.CompilerParams(
            dimension_semantics=("parallel",),      # shards across v7x's 2 TCs
            vmem_limit_bytes=32 * 1024 * 1024,      # above v5e's 16 MiB scoped default
        ),
        cost_estimate=cost,
    )(w_eye, x2, x2)

    # Drop padding; torch.sum(..., keepdim=True) -> output shape (B, 1, N).
    return out2d[:B, :N].reshape(B, 1, N)


class Dense:
    """JAX/Pallas mirror of the PyTorch Dense module."""

    def __init__(self):
        self.w_eye = jnp.eye(2, dtype=jnp.float32)   # nn.Parameter(torch.eye(2))

    def forward(self, x):
        # TODO(synk): PyTorch also computes F.softmax(x.view(B,-1),1).data.numpy()
        # into a local (host pull, dead w.r.t. the returned tensor) — dropped.
        return dense_forward(x, self.w_eye)


def _reference(x, w_eye):
    """Pure-JAX reference of the PyTorch forward."""
    y = jnp.einsum("ij,bjn->bin", w_eye, x)
    s = jnp.sum(y, axis=1, keepdims=True)
    return jax.nn.softmax(s, axis=2)


if __name__ == "__main__":
    key0, key1 = jax.random.split(jax.random.PRNGKey(0))
    mod = Dense()

    # Lane/sublane-aligned shape (no padding path).
    B, N = 16, 256
    x = jax.random.normal(key0, (B, 2, N), dtype=jnp.float32)
    out = jax.block_until_ready(mod.forward(x))
    ref = _reference(x, mod.w_eye)
    assert out.shape == (B, 1, N) and out.dtype == x.dtype
    assert bool(jnp.allclose(out, ref, atol=1e-6, rtol=1e-5)), "dense fwd mismatch"

    # Unaligned shape: exercises batch + lane padding and the masked softmax.
    B2, N2 = 5, 200
    xu = jax.random.normal(key1, (B2, 2, N2), dtype=jnp.float32)
    out_u = jax.block_until_ready(mod.forward(xu))
    ref_u = _reference(xu, mod.w_eye)
    assert out_u.shape == (B2, 1, N2) and out_u.dtype == xu.dtype
    assert bool(jnp.allclose(out_u, ref_u, atol=1e-6, rtol=1e-5)), "padded fwd mismatch"

    print("KERNEL_OK")
</pallas_src>

<mosaic_0001>
module attributes {stable_mosaic.version = 11 : i64} {
  func.func @_dense_kernel(%arg0: i32, %arg1: memref<2x2xf32, #tpu.memory_space<smem>>, %arg2: memref<8x256xf32, #tpu.memory_space<vmem>>, %arg3: memref<8x256xf32, #tpu.memory_space<vmem>>, %arg4: memref<8x256xf32, #tpu.memory_space<vmem>>) attributes {dimension_semantics = [#tpu.dimension_semantics<parallel>], iteration_bounds = array<i64: 2>, scalar_prefetch = 0 : i64, scratch_operands = 0 : i64, tpu.core_type = #tpu.core_type<tc>, window_params = [{transform_indices = @transform_0, window_bounds = array<i64: 2, 2>}, {transform_indices = @transform_1, window_bounds = array<i64: 8, 256>}, {transform_indices = @transform_2, window_bounds = array<i64: 8, 256>}, {transform_indices = @transform_3, window_bounds = array<i64: 8, 256>}]} {
    %c0 = arith.constant 0 : index
    %c0_0 = arith.constant 0 : index
    %0 = memref.load %arg1[%c0, %c0_0] : memref<2x2xf32, #tpu.memory_space<smem>>
    %c1 = arith.constant 1 : index
    %c0_1 = arith.constant 0 : index
    %1 = memref.load %arg1[%c1, %c0_1] : memref<2x2xf32, #tpu.memory_space<smem>>
    %2 = arith.addf %0, %1 : f32
    %c0_2 = arith.constant 0 : index
    %c1_3 = arith.constant 1 : index
    %3 = memref.load %arg1[%c0_2, %c1_3] : memref<2x2xf32, #tpu.memory_space<smem>>
    %c1_4 = arith.constant 1 : index
    %c1_5 = arith.constant 1 : index
    %4 = memref.load %arg1[%c1_4, %c1_5] : memref<2x2xf32, #tpu.memory_space<smem>>
    %5 = arith.addf %3, %4 : f32
    %c0_6 = arith.constant 0 : index
    %c0_7 = arith.constant 0 : index
    %6 = vector.load %arg2[%c0_6, %c0_7] : memref<8x256xf32, #tpu.memory_space<vmem>>, vector<8x256xf32>
    %7 = vector.broadcast %2 : f32 to vector<8x256xf32>
    %8 = arith.mulf %7, %6 : vector<8x256xf32>
    %c0_8 = arith.constant 0 : index
    %c0_9 = arith.constant 0 : index
    %9 = vector.load %arg3[%c0_8, %c0_9] : memref<8x256xf32, #tpu.memory_space<vmem>>, vector<8x256xf32>
    %10 = vector.broadcast %5 : f32 to vector<8x256xf32>
    %11 = arith.mulf %10, %9 : vector<8x256xf32>
    %12 = arith.addf %8, %11 : vector<8x256xf32>
    %cst = arith.constant dense<0xFF800000> : vector<8xf32>
    %13 = vector.multi_reduction <maximumf>, %12, %cst [1] : vector<8x256xf32> to vector<8xf32>
    %14 = vector.shape_cast %13 : vector<8xf32> to vector<8x1xf32>
    %15 = vector.broadcast %14 : vector<8x1xf32> to vector<8x256xf32>
    %16 = arith.subf %12, %15 : vector<8x256xf32>
    %17 = math.exp %16 : vector<8x256xf32>
    %cst_10 = arith.constant dense<0.000000e+00> : vector<8xf32>
    %18 = vector.multi_reduction <add>, %17, %cst_10 [1] : vector<8x256xf32> to vector<8xf32>
    %19 = vector.shape_cast %18 : vector<8xf32> to vector<8x1xf32>
    %20 = vector.broadcast %19 : vector<8x1xf32> to vector<8x256xf32>
    %21 = arith.divf %17, %20 : vector<8x256xf32>
    %c0_11 = arith.constant 0 : index
    %c0_12 = arith.constant 0 : index
    %22 = vector.load %arg4[%c0_11, %c0_12] : memref<8x256xf32, #tpu.memory_space<vmem>>, vector<8x256xf32>
    tpu.vector_store %arg4[%c0_11, %c0_12], %21 {strides = array<i32>} : memref<8x256xf32, #tpu.memory_space<vmem>>, vector<8x256xf32>,
    return
  }
  func.func @transform_0(%arg0: i32) -> (i32, i32) {
    %c0_i32 = arith.constant 0 : i32
    %c0_i32_0 = arith.constant 0 : i32
    %c0_i32_1 = arith.constant 0 : i32
    return %c0_i32, %c0_i32_0 : i32, i32
  }
  func.func @transform_1(%arg0: i32) -> (i32, i32) {
    %c0_i32 = arith.constant 0 : i32
    %c0_i32_0 = arith.constant 0 : i32
    return %arg0, %c0_i32 : i32, i32
  }
  func.func @transform_2(%arg0: i32) -> (i32, i32) {
    %c1_i32 = arith.constant 1 : i32
    %c0_i32 = arith.constant 0 : i32
    return %arg0, %c1_i32 : i32, i32
  }
  func.func @transform_3(%arg0: i32) -> (i32, i32) {
    %c0_i32 = arith.constant 0 : i32
    %c0_i32_0 = arith.constant 0 : i32
    return %arg0, %c0_i32 : i32, i32
  }
}

</mosaic_0001>

<bundles_post_ra>
// kernel: dense_forward.1
= control target key start
LH: loop header
LB: loop body
LE: loop exit
PB: predicated region body
PF: predicated region fallthrough
CT: control target
= control target key end

     0   :  { %8 = vsyncpa [#allocation3], 0  ;;  %s424_s12 = smov 0   ;;  %s462_s0 = inlined_call_operand.vmem [shape: f32[2,2], index: 0, kind: input, shape index: {}]   ;;  %s463_s1 = inlined_call_operand.vmem [shape: f32[16,512], index: 1, kind: input, shape index: {}, may-alias: {1,2}]   ;;  %s464_s2 = inlined_call_operand.vmem [shape: f32[16,512], index: 2, kind: input, shape index: {}, may-alias: {1,2}]   ;;  %s465_s3 = inlined_call_operand.vmem [shape: f32[16,256], index: 3, kind: output, shape index: {}]  }
   0x1 LB: > { %s328_s13 = sadd.s32 4294967295, %s401_s12   ;;  %p330_p0 = scmp.ge.s32.totalorder %s401_s12, 1  ;;  %s401_s12 = sphi %s424_s12, %s14_s12  }
   0x2   : > { %p118_p1 = scmp.lt.s32.totalorder %s401_s12, 3  ;;  %s131_s16 = sshll.u32 %s462_s0, 4  ;;  %s132_s16 = int_to_ptr.vmem [resolvable:$true] %s131_s16 }
   0x3   : > { %p359_p3 = scmp.eq.s32.totalorder %s328_s13, 0  ;;  %s376_s18 = scalar_lea.vmem %s132_s16, 32 }
   0x4   : > { %p435_p2 = pnand %p330_p0, %p118_p1  ;;  %p377_p6 = scmp.ne.s32.totalorder %s132_s16, %s376_s18 }
   0x5   : > { %p384_p10 = scmp.lt.s32.totalorder %s132_s16, %s132_s16  ;;  %p385_p11 = scmp.lt.s32.totalorder %s376_s18, %s376_s18 }
   0x6   : > { %p355_p4 = pneg %p435_p2 }
   0x7   : > { %p386_p12 = por %p385_p11, %p384_p10 }
   0x8   : > { %p356_p5 = pnand %p359_p3, %p355_p4 }
   0xa   : > { %p378_p7 = pneg %p356_p5 }
   0xc   : > { %p379_p8 = pnand %p378_p7, %p377_p6 }
   0xe   : > { %p380_p9 = pneg %p379_p8 }
  0x10   : > { %p387_p13 = pnand %p386_p12, %p380_p9 }
  0x12   : > { %390 = shalt.err (!%p387_p13)
}
  0x13   : > { %s403_s19 = smov [#allocation2]   ;;  %161 = sbr.rel (%p435_p2) target bundleno = 362 (0x16a), region = 32 }
  0x14   : > { %358 = dma.vmem_to_smem (!%p356_p5), %s132_s16, 32, %s403_s19, [#allocation3]  }
  0x1a   : > { %396 = dma.done.wait (%p359_p3), [#allocation3], 32  }
  0x1b   : > { %398 = vsyncadd (%p359_p3), [#allocation3], 4294967264 }
  0x1c   : > { %167 = sfence }
  0x1d   : > { %p192_p0 = scmp.lt.s32.totalorder %s328_s13, 1  ;;  %s208_s20 = sld [smem:[#allocation2]] }
  0x1e   : > { %s341_s21 = sld [smem:[#allocation2 + $0x80]]  ;;  %s342_s22 = sld [smem:[#allocation2 + $0x1]] }
  0x1f   : > { %s468_s13 = smov (!%p192_p0, %s328_s13), 1  ;;  %s343_s23 = sld [smem:[#allocation2 + $0x81]] }
  0x20   : > { %s348_s24 = sshll.u32 %s468_s13, 5  ;;  %s350_s6 = sshll.u32 %s468_s13, 4 }
  0x21   : > { %s196_s27 = scalar_lea.vmem %s463_s1, %s348_s24  ;;  %s285_s30 = scalar_lea.vmem %s464_s2, %s348_s24 }
  0x22   : > { %v214_v0 = vld [vmem:[%s196_s27] sm:$0xff]  ;;  %v215_v1 = vld [vmem:[%s196_s27 + $0x8] sm:$0xff]  ;;  %v344_v3 = vld [vmem:[%s285_s30 + $0x10] sm:$0xff]  ;;  %s207_s9 = scalar_lea.vmem %s465_s3, %s350_s6 }
  0x23   : > { %v345_v4 = vld [vmem:[%s285_s30 + $0x18] sm:$0xff] }
  0x24   : > { %s210_s4 = sadd.f32 %s341_s21, %s208_s20 }
  0x25   : > { %s213_s5 = sadd.f32 %s343_s23, %s342_s22 }
  0x26   : > { %v216_v2 = vstv %s210_s4 }
  0x27   : > { %v217_v5 = vmul.f32 %v216_v2, %v214_v0  ;;  %v218_v6 = vmul.f32 %v216_v2, %v215_v1  ;;  %v221_v7 = vstv %s213_s5 }
  0x28   : > { %v222_v8 = vmul.f32 %v344_v3, %v221_v7  ;;  %v223_v9 = vmul.f32 %v345_v4, %v221_v7 }
  0x2a   : > { %v224_v10 = vadd.f32 %v222_v8, %v217_v5  ;;  %v225_v11 = vadd.f32 %v223_v9, %v218_v6 }
  0x2c   : > { %v226_v12 = vmax.f32 %v224_v10, %v225_v11 }
  0x2e   : > { %227 = vmax.xlane.f32.xlu0 %v226_v12 }
  0xbb   : > { %v228_v13 = vpop.xlane.xlu0 %227 }
  0xbc   : > { %v229_v14 = vsub.f32 %v224_v10, %v228_v13  ;;  %v230_v15 = vsub.f32 %v225_v11, %v228_v13 }
  0xbe   : > { %v231_v16 = vmul.f32 1.442695, %v229_v14  ;;  %v233_v17 = vmul.f32 1.442695, %v230_v15 }
  0xc0   : > { %370 = vpow2.f32 %v231_v16 }
  0xc1   : > { %372 = vpow2.f32 %v233_v17 }
  0xca   : > { %v371_v18 = vpop.eup %370 }
  0xcb   : > { %v373_v19 = vpop.eup %372 }
  0xcc   : > { %v235_v20 = vadd.f32 %v373_v19, %v371_v18 }
  0xce   : > { %236 = vadd.xlane.f32.xlu0 %v235_v20 }
 0x15b   : > { %v237_v21 = vpop.xlane.xlu0 %236 }
 0x15c   : > { %374 = vrcp.f32 %v237_v21 }
 0x166   : > { %v375_v22 = vpop.eup %374 }
 0x167   : > { %v239_v23 = vmul.f32 %v375_v22, %v371_v18  ;;  %v240_v24 = vmul.f32 %v375_v22, %v373_v19 }
 0x169   : > { %241 = vst [vmem:[%s207_s9] sm:$0xff] %v239_v23  ;;  %242 = vst [vmem:[%s207_s9 + $0x8] sm:$0xff] %v240_v24 }
 0x16a PF: > { %s14_s12 = sadd.s32 1, %s401_s12  }
 0x16b   : > { %p11_p1 = scmp.ge.s32.totalorder %s14_s12, 4  }
 0x16d   :  { %13 = sbr.rel (!%p11_p1) target bundleno = 1 (0x1), region = 70 }
 0x174   :  { %264 = vsyncpa [#allocation3], 1 }
 0x175   :  { %266 = vsyncpa [#allocation3 + $0x1], 1 }

</bundles_post_ra>
